<compile_context>
chip_gen: v7x
topology: tpu7x:2x2x1
jax: 0.10.0
libtpu: 0.0.40
codegen_flags: <defaults>
</compile_context>

<pallas_src>
import jax
import jax.numpy as jnp
from jax.experimental import pallas as pl
from jax.experimental.pallas import tpu as pltpu

EPS = 1e-5
B, L = 2, 11            # AvgPool1d(kernel_size=11) + .view requires L == 11
C_IN, C1, C2, C3 = 6, 160, 96, 96
D1, D_OUT = 256, 199


def player_cnn_kernel(x_ref, w1_ref, w2_ref, w3_ref, wd1_ref, wd2_ref,
                      bias_ref, o_ref):
    f32, bf16 = jnp.float32, jnp.bfloat16

    x = x_ref[...].astype(bf16)                                    # (L, 6)

    # conv1 (1x1, bias+BN folded) + ReLU
    h = jnp.dot(x, w1_ref[...], preferred_element_type=f32)
    h = jnp.maximum(h + bias_ref[0:1, :C1], 0.0).astype(bf16)      # (L, 160)

    # conv2 (1x1, bias+BN folded) + ReLU
    h = jnp.dot(h, w2_ref[...], preferred_element_type=f32)
    h = jnp.maximum(h + bias_ref[1:2, :C2], 0.0).astype(bf16)      # (L, 96)

    # conv3 (1x1, bias+BN folded) + ReLU
    h = jnp.dot(h, w3_ref[...], preferred_element_type=f32)
    h = jnp.maximum(h + bias_ref[2:3, :C3], 0.0).astype(bf16)      # (L, 96)

    # AvgPool1d(L) as a pooling matmul (stays on MXU, no cross-sublane reduce)
    pool = jnp.ones((1, L), bf16)
    pooled = jnp.dot(pool, h, preferred_element_type=f32) * (1.0 / L)   # (1, 96)

    # dense1 (bias+BN folded) + ReLU
    d = jnp.dot(pooled.astype(bf16), wd1_ref[...], preferred_element_type=f32)
    d = jnp.maximum(d + bias_ref[3:4, :D1], 0.0).astype(bf16)      # (1, 256)

    # dense2 + softmax(dim=1)
    logits = (jnp.dot(d, wd2_ref[...], preferred_element_type=f32)
              + bias_ref[4:5, :D_OUT])                             # (1, 199)
    m = jnp.max(logits, axis=-1, keepdims=True)
    e = jnp.exp(logits - m)
    o_ref[...] = e * pl.reciprocal(jnp.sum(e, axis=-1, keepdims=True),
                                   approx=True)


@jax.jit
def player_cnn(x, params):
    w1, w2, w3, wd1, wd2, bias = params
    bsz = x.shape[0]
    out = pl.pallas_call(
        player_cnn_kernel,
        out_shape=jax.ShapeDtypeStruct((bsz, 1, D_OUT), jnp.float32),
        grid=(bsz,),
        in_specs=[
            pl.BlockSpec((pl.Squeezed(), L, C_IN), lambda b: (b, 0, 0)),
            pl.BlockSpec((C_IN, C1), lambda b: (0, 0)),
            pl.BlockSpec((C1, C2), lambda b: (0, 0)),
            pl.BlockSpec((C2, C3), lambda b: (0, 0)),
            pl.BlockSpec((C3, D1), lambda b: (0, 0)),
            pl.BlockSpec((D1, D_OUT), lambda b: (0, 0)),
            pl.BlockSpec((8, 256), lambda b: (0, 0)),
        ],
        out_specs=pl.BlockSpec((pl.Squeezed(), 1, D_OUT), lambda b: (b, 0, 0)),
        compiler_params=pltpu.CompilerParams(
            dimension_semantics=("parallel",)),
    )(x, w1, w2, w3, wd1, wd2, bias)
    return out[:, 0, :]


# ---------------------------------------------------------------------------
# Parameter construction / BN folding / pure-JAX reference
# ---------------------------------------------------------------------------

def init_raw_params(key):
    ks = iter(jax.random.split(key, 26))

    def w(shape, fan_in):
        return jax.random.normal(next(ks), shape, jnp.float32) / jnp.sqrt(fan_in)

    def b(c):
        return 0.1 * jax.random.normal(next(ks), (c,), jnp.float32)

    def bn(c):
        gamma = 1.0 + 0.1 * jax.random.normal(next(ks), (c,), jnp.float32)
        beta = 0.1 * jax.random.normal(next(ks), (c,), jnp.float32)
        mean = 0.1 * jax.random.normal(next(ks), (c,), jnp.float32)
        var = jnp.abs(1.0 + 0.1 * jax.random.normal(next(ks), (c,), jnp.float32))
        return gamma, beta, mean, var

    # conv/linear weights stored transposed as (C_in, C_out) so layer == x @ W
    return {
        "w1": w((C_IN, C1), C_IN), "b1": b(C1), "bn1": bn(C1),
        "w2": w((C1, C2), C1),     "b2": b(C2), "bn2": bn(C2),
        "w3": w((C2, C3), C2),     "b3": b(C3), "bn3": bn(C3),
        "wd1": w((C3, D1), C3),    "bd1": b(D1), "bnd1": bn(D1),
        "wd2": w((D1, D_OUT), D1), "bd2": b(D_OUT),
    }


def fold_params(raw):
    """Fold bias + eval-mode BN into weights; pack remaining biases into one slab."""
    def fold(w, b, bn):
        gamma, beta, mean, var = bn
        s = gamma / jnp.sqrt(var + EPS)
        return (w * s[None, :]).astype(jnp.bfloat16), b * s + (beta - mean * s)

    w1, b1 = fold(raw["w1"], raw["b1"], raw["bn1"])
    w2, b2 = fold(raw["w2"], raw["b2"], raw["bn2"])
    w3, b3 = fold(raw["w3"], raw["b3"], raw["bn3"])
    wd1, bd1 = fold(raw["wd1"], raw["bd1"], raw["bnd1"])
    wd2 = raw["wd2"].astype(jnp.bfloat16)
    bd2 = raw["bd2"]

    slab = jnp.zeros((8, 256), jnp.float32)
    slab = (slab.at[0, :C1].set(b1)
                .at[1, :C2].set(b2)
                .at[2, :C3].set(b3)
                .at[3, :D1].set(bd1)
                .at[4, :D_OUT].set(bd2))
    return (w1, w2, w3, wd1, wd2, slab)


def reference(x, raw):
    """Pure-JAX f32 reference of the same eval-mode forward pass (unfolded)."""
    def bn_eval(h, bn):
        gamma, beta, mean, var = bn
        return (h - mean) / jnp.sqrt(var + EPS) * gamma + beta

    h = jax.nn.relu(bn_eval(jnp.einsum('blc,cd->bld', x, raw["w1"]) + raw["b1"], raw["bn1"]))
    h = jax.nn.relu(bn_eval(jnp.einsum('blc,cd->bld', h, raw["w2"]) + raw["b2"], raw["bn2"]))
    h = jax.nn.relu(bn_eval(jnp.einsum('blc,cd->bld', h, raw["w3"]) + raw["b3"], raw["bn3"]))
    pooled = jnp.mean(h, axis=1)
    d = jax.nn.relu(bn_eval(pooled @ raw["wd1"] + raw["bd1"], raw["bnd1"]))
    logits = d @ raw["wd2"] + raw["bd2"]
    return jax.nn.softmax(logits, axis=1)


if __name__ == "__main__":
    key = jax.random.PRNGKey(0)
    k_x, k_p = jax.random.split(key)
    x = jax.random.normal(k_x, (B, L, C_IN), jnp.float32)   # (batch, seq=11, features=6)

    raw = init_raw_params(k_p)
    params = fold_params(raw)

    out = jax.block_until_ready(player_cnn(x, params))
    ref = reference(x, raw)

    assert out.shape == (B, D_OUT)
    # bf16 MXU operands + approx reciprocal => relaxed tolerances vs f32 reference
    assert jnp.allclose(jnp.sum(out, axis=1), 1.0, atol=5e-3)
    assert jnp.allclose(out, ref, atol=5e-3)
    print("KERNEL_OK")
</pallas_src>

<mosaic_0001>
module attributes {stable_mosaic.version = 11 : i64} {
  func.func @player_cnn_kernel(%arg0: i32, %arg1: memref<1x11x6xf32, #tpu.memory_space<vmem>>, %arg2: memref<6x160xbf16, #tpu.memory_space<vmem>>, %arg3: memref<160x96xbf16, #tpu.memory_space<vmem>>, %arg4: memref<96x96xbf16, #tpu.memory_space<vmem>>, %arg5: memref<96x256xbf16, #tpu.memory_space<vmem>>, %arg6: memref<256x199xbf16, #tpu.memory_space<vmem>>, %arg7: memref<8x256xf32, #tpu.memory_space<vmem>>, %arg8: memref<1x1x199xf32, #tpu.memory_space<vmem>>) attributes {dimension_semantics = [#tpu.dimension_semantics<parallel>], iteration_bounds = array<i64: 2>, scalar_prefetch = 0 : i64, scratch_operands = 0 : i64, tpu.core_type = #tpu.core_type<tc>, window_params = [{transform_indices = @transform_0, window_bounds = array<i64: 1, 11, 6>}, {pipeline_mode = #tpu.pipeline_mode<synchronous>, transform_indices = @transform_1, window_bounds = array<i64: 6, 160>}, {pipeline_mode = #tpu.pipeline_mode<synchronous>, transform_indices = @transform_2, window_bounds = array<i64: 160, 96>}, {pipeline_mode = #tpu.pipeline_mode<synchronous>, transform_indices = @transform_3, window_bounds = array<i64: 96, 96>}, {pipeline_mode = #tpu.pipeline_mode<synchronous>, transform_indices = @transform_4, window_bounds = array<i64: 96, 256>}, {pipeline_mode = #tpu.pipeline_mode<synchronous>, transform_indices = @transform_5, window_bounds = array<i64: 256, 199>}, {pipeline_mode = #tpu.pipeline_mode<synchronous>, transform_indices = @transform_6, window_bounds = array<i64: 8, 256>}, {transform_indices = @transform_7, window_bounds = array<i64: 1, 1, 199>}]} {
    %c0 = arith.constant 0 : index
    %c0_0 = arith.constant 0 : index
    %c0_1 = arith.constant 0 : index
    %0 = vector.load %arg1[%c0, %c0_0, %c0_1] : memref<1x11x6xf32, #tpu.memory_space<vmem>>, vector<1x11x6xf32>
    %1 = vector.shape_cast %0 : vector<1x11x6xf32> to vector<11x6xf32>
    %2 = arith.truncf %1 : vector<11x6xf32> to vector<11x6xbf16>
    %c0_2 = arith.constant 0 : index
    %c0_3 = arith.constant 0 : index
    %3 = vector.load %arg2[%c0_2, %c0_3] : memref<6x160xbf16, #tpu.memory_space<vmem>>, vector<6x160xbf16>
    %cst = arith.constant dense<0.000000e+00> : vector<11x160xf32>
    %4 = tpu.matmul %2, %3, %cst {dimension_numbers = #tpu.dot_dimension_numbers<[1], [0], [0], [1], [0, 0, 1, 1], [], []>} : vector<11x6xbf16>, vector<6x160xbf16>, vector<11x160xf32> -> vector<11x160xf32>
    %c0_4 = arith.constant 0 : index
    %c0_5 = arith.constant 0 : index
    %5 = vector.load %arg7[%c0_4, %c0_5] : memref<8x256xf32, #tpu.memory_space<vmem>>, vector<1x160xf32>
    %6 = vector.broadcast %5 : vector<1x160xf32> to vector<11x160xf32>
    %7 = arith.addf %4, %6 : vector<11x160xf32>
    %cst_6 = arith.constant 0.000000e+00 : f32
    %8 = vector.broadcast %cst_6 : f32 to vector<11x160xf32>
    %9 = arith.maximumf %7, %8 : vector<11x160xf32>
    %10 = arith.truncf %9 : vector<11x160xf32> to vector<11x160xbf16>
    %c0_7 = arith.constant 0 : index
    %c0_8 = arith.constant 0 : index
    %11 = vector.load %arg3[%c0_7, %c0_8] : memref<160x96xbf16, #tpu.memory_space<vmem>>, vector<160x96xbf16>
    %cst_9 = arith.constant dense<0.000000e+00> : vector<11x96xf32>
    %12 = tpu.matmul %10, %11, %cst_9 {dimension_numbers = #tpu.dot_dimension_numbers<[1], [0], [0], [1], [0, 0, 1, 1], [], []>} : vector<11x160xbf16>, vector<160x96xbf16>, vector<11x96xf32> -> vector<11x96xf32>
    %c1 = arith.constant 1 : index
    %c0_10 = arith.constant 0 : index
    %13 = vector.load %arg7[%c1, %c0_10] : memref<8x256xf32, #tpu.memory_space<vmem>>, vector<1x96xf32>
    %14 = vector.broadcast %13 : vector<1x96xf32> to vector<11x96xf32>
    %15 = arith.addf %12, %14 : vector<11x96xf32>
    %cst_11 = arith.constant 0.000000e+00 : f32
    %16 = vector.broadcast %cst_11 : f32 to vector<11x96xf32>
    %17 = arith.maximumf %15, %16 : vector<11x96xf32>
    %18 = arith.truncf %17 : vector<11x96xf32> to vector<11x96xbf16>
    %c0_12 = arith.constant 0 : index
    %c0_13 = arith.constant 0 : index
    %19 = vector.load %arg4[%c0_12, %c0_13] : memref<96x96xbf16, #tpu.memory_space<vmem>>, vector<96x96xbf16>
    %cst_14 = arith.constant dense<0.000000e+00> : vector<11x96xf32>
    %20 = tpu.matmul %18, %19, %cst_14 {dimension_numbers = #tpu.dot_dimension_numbers<[1], [0], [0], [1], [0, 0, 1, 1], [], []>} : vector<11x96xbf16>, vector<96x96xbf16>, vector<11x96xf32> -> vector<11x96xf32>
    %c2 = arith.constant 2 : index
    %c0_15 = arith.constant 0 : index
    %21 = vector.load %arg7[%c2, %c0_15] : memref<8x256xf32, #tpu.memory_space<vmem>>, vector<1x96xf32>
    %22 = vector.broadcast %21 : vector<1x96xf32> to vector<11x96xf32>
    %23 = arith.addf %20, %22 : vector<11x96xf32>
    %cst_16 = arith.constant 0.000000e+00 : f32
    %24 = vector.broadcast %cst_16 : f32 to vector<11x96xf32>
    %25 = arith.maximumf %23, %24 : vector<11x96xf32>
    %26 = arith.truncf %25 : vector<11x96xf32> to vector<11x96xbf16>
    %cst_17 = arith.constant 1.000000e+00 : bf16
    %27 = vector.broadcast %cst_17 : bf16 to vector<1x11xbf16>
    %cst_18 = arith.constant dense<0.000000e+00> : vector<1x96xf32>
    %28 = tpu.matmul %27, %26, %cst_18 {dimension_numbers = #tpu.dot_dimension_numbers<[1], [0], [0], [1], [0, 0, 1, 1], [], []>} : vector<1x11xbf16>, vector<11x96xbf16>, vector<1x96xf32> -> vector<1x96xf32>
    %cst_19 = arith.constant 0.0909090936 : f32
    %29 = vector.broadcast %cst_19 : f32 to vector<1x96xf32>
    %30 = arith.mulf %28, %29 : vector<1x96xf32>
    %31 = arith.truncf %30 : vector<1x96xf32> to vector<1x96xbf16>
    %c0_20 = arith.constant 0 : index
    %c0_21 = arith.constant 0 : index
    %32 = vector.load %arg5[%c0_20, %c0_21] : memref<96x256xbf16, #tpu.memory_space<vmem>>, vector<96x256xbf16>
    %cst_22 = arith.constant dense<0.000000e+00> : vector<1x256xf32>
    %33 = tpu.matmul %31, %32, %cst_22 {dimension_numbers = #tpu.dot_dimension_numbers<[1], [0], [0], [1], [0, 0, 1, 1], [], []>} : vector<1x96xbf16>, vector<96x256xbf16>, vector<1x256xf32> -> vector<1x256xf32>
    %c3 = arith.constant 3 : index
    %c0_23 = arith.constant 0 : index
    %34 = vector.load %arg7[%c3, %c0_23] : memref<8x256xf32, #tpu.memory_space<vmem>>, vector<1x256xf32>
    %35 = arith.addf %33, %34 : vector<1x256xf32>
    %cst_24 = arith.constant 0.000000e+00 : f32
    %36 = vector.broadcast %cst_24 : f32 to vector<1x256xf32>
    %37 = arith.maximumf %35, %36 : vector<1x256xf32>
    %38 = arith.truncf %37 : vector<1x256xf32> to vector<1x256xbf16>
    %c0_25 = arith.constant 0 : index
    %c0_26 = arith.constant 0 : index
    %39 = vector.load %arg6[%c0_25, %c0_26] : memref<256x199xbf16, #tpu.memory_space<vmem>>, vector<256x199xbf16>
    %cst_27 = arith.constant dense<0.000000e+00> : vector<1x199xf32>
    %40 = tpu.matmul %38, %39, %cst_27 {dimension_numbers = #tpu.dot_dimension_numbers<[1], [0], [0], [1], [0, 0, 1, 1], [], []>} : vector<1x256xbf16>, vector<256x199xbf16>, vector<1x199xf32> -> vector<1x199xf32>
    %c4 = arith.constant 4 : index
    %c0_28 = arith.constant 0 : index
    %41 = vector.load %arg7[%c4, %c0_28] : memref<8x256xf32, #tpu.memory_space<vmem>>, vector<1x199xf32>
    %42 = arith.addf %40, %41 : vector<1x199xf32>
    %cst_29 = arith.constant dense<0xFF800000> : vector<1xf32>
    %43 = vector.multi_reduction <maximumf>, %42, %cst_29 [1] : vector<1x199xf32> to vector<1xf32>
    %44 = vector.shape_cast %43 : vector<1xf32> to vector<1x1xf32>
    %45 = vector.broadcast %44 : vector<1x1xf32> to vector<1x199xf32>
    %46 = arith.subf %42, %45 : vector<1x199xf32>
    %47 = math.exp %46 : vector<1x199xf32>
    %cst_30 = arith.constant dense<0.000000e+00> : vector<1xf32>
    %48 = vector.multi_reduction <add>, %47, %cst_30 [1] : vector<1x199xf32> to vector<1xf32>
    %49 = vector.shape_cast %48 : vector<1xf32> to vector<1x1xf32>
    %50 = tpu.reciprocal %49 {approx = true} : vector<1x1xf32> -> vector<1x1xf32>
    %51 = vector.broadcast %50 : vector<1x1xf32> to vector<1x199xf32>
    %52 = arith.mulf %47, %51 : vector<1x199xf32>
    %c0_31 = arith.constant 0 : index
    %c0_32 = arith.constant 0 : index
    %c0_33 = arith.constant 0 : index
    %53 = vector.load %arg8[%c0_31, %c0_32, %c0_33] : memref<1x1x199xf32, #tpu.memory_space<vmem>>, vector<1x1x199xf32>
    %54 = vector.shape_cast %53 : vector<1x1x199xf32> to vector<1x199xf32>
    %55 = vector.shape_cast %52 : vector<1x199xf32> to vector<1x1x199xf32>
    tpu.vector_store %arg8[%c0_31, %c0_32, %c0_33], %55 {strides = array<i32>} : memref<1x1x199xf32, #tpu.memory_space<vmem>>, vector<1x1x199xf32>,
    return
  }
  func.func @transform_0(%arg0: i32) -> (i32, i32, i32) {
    %c0_i32 = arith.constant 0 : i32
    %c0_i32_0 = arith.constant 0 : i32
    %c0_i32_1 = arith.constant 0 : i32
    return %arg0, %c0_i32, %c0_i32_0 : i32, i32, i32
  }
  func.func @transform_1(%arg0: i32) -> (i32, i32) {
    %c0_i32 = arith.constant 0 : i32
    %c0_i32_0 = arith.constant 0 : i32
    %c0_i32_1 = arith.constant 0 : i32
    return %c0_i32, %c0_i32_0 : i32, i32
  }
  func.func @transform_2(%arg0: i32) -> (i32, i32) {
    %c0_i32 = arith.constant 0 : i32
    %c0_i32_0 = arith.constant 0 : i32
    %c0_i32_1 = arith.constant 0 : i32
    return %c0_i32, %c0_i32_0 : i32, i32
  }
  func.func @transform_3(%arg0: i32) -> (i32, i32) {
    %c0_i32 = arith.constant 0 : i32
    %c0_i32_0 = arith.constant 0 : i32
    %c0_i32_1 = arith.constant 0 : i32
    return %c0_i32, %c0_i32_0 : i32, i32
  }
  func.func @transform_4(%arg0: i32) -> (i32, i32) {
    %c0_i32 = arith.constant 0 : i32
    %c0_i32_0 = arith.constant 0 : i32
    %c0_i32_1 = arith.constant 0 : i32
    return %c0_i32, %c0_i32_0 : i32, i32
  }
  func.func @transform_5(%arg0: i32) -> (i32, i32) {
    %c0_i32 = arith.constant 0 : i32
    %c0_i32_0 = arith.constant 0 : i32
    %c0_i32_1 = arith.constant 0 : i32
    return %c0_i32, %c0_i32_0 : i32, i32
  }
  func.func @transform_6(%arg0: i32) -> (i32, i32) {
    %c0_i32 = arith.constant 0 : i32
    %c0_i32_0 = arith.constant 0 : i32
    %c0_i32_1 = arith.constant 0 : i32
    return %c0_i32, %c0_i32_0 : i32, i32
  }
  func.func @transform_7(%arg0: i32) -> (i32, i32, i32) {
    %c0_i32 = arith.constant 0 : i32
    %c0_i32_0 = arith.constant 0 : i32
    %c0_i32_1 = arith.constant 0 : i32
    return %arg0, %c0_i32, %c0_i32_0 : i32, i32, i32
  }
}

</mosaic_0001>

<bundles_post_ra>
// kernel: player_cnn.1
= control target key start
LH: loop header
LB: loop body
LE: loop exit
PB: predicated region body
PF: predicated region fallthrough
CT: control target
= control target key end

     0   :  { %s1385_s24 = smov 0   ;;  %s1639_s0 = inlined_call_operand.vmem [shape: f32[2,11,6], index: 0, kind: input, shape index: {}]   ;;  %s1640_s1 = inlined_call_operand.vmem [shape: bf16[6,160], index: 1, kind: input, shape index: {}]   ;;  %s1641_s2 = inlined_call_operand.vmem [shape: bf16[160,96], index: 2, kind: input, shape index: {}]   ;;  %s1642_s3 = inlined_call_operand.vmem [shape: bf16[96,96], index: 3, kind: input, shape index: {}]   ;;  %s1643_s4 = inlined_call_operand.vmem [shape: bf16[96,256], index: 4, kind: input, shape index: {}]   ;;  %s1644_s5 = inlined_call_operand.vmem [shape: bf16[256,199], index: 5, kind: input, shape index: {}]   ;;  %s1645_s6 = inlined_call_operand.vmem [shape: f32[8,256], index: 6, kind: input, shape index: {}]   ;;  %s1646_s7 = inlined_call_operand.vmem [shape: f32[2,1,199], index: 7, kind: output, shape index: {}]  }
   0x1 LB: > { %s1115_s25 = sadd.s32 4294967295, %s1337_s24   ;;  %p1119_p0 = scmp.ge.s32.totalorder %s1337_s24, 1  ;;  %s1337_s24 = sphi %s1385_s24, %s17_s24  }
   0x2   : > { %p237_p1 = scmp.lt.s32.totalorder %s1337_s24, 3 }
   0x4   : > { %p238_p2 = pnand %p1119_p0, %p237_p1 }
   0x5   : > { %v282_v0 = vld [vmem:[%s1640_s1] sm:$0x77] (!%p238_p2)  ;;  %vm304_vm0 = vcmask (!%p238_p2), 1042432   ;;  %p268_p3 = scmp.lt.s32.totalorder (!%p238_p2), %s1115_s25, 1  ;;  %v1339_v3 = vmov (!%p238_p2), 0   ;;  %vm300_vm1 = vcmask (!%p238_p2), 48128   ;;  %v285_v23 = vlaneseq (!%p238_p2) }
   0x6   : > { %241 = sbr.rel (%p238_p2) target bundleno = 1663 (0x67f), region = 48  ;;  %v1124_v1 = vcombine.high (!%p238_p2), %v282_v0, %v282_v0  ;;  %v1123_v2 = vcombine.low (!%p238_p2), %v282_v0, %v282_v0  ;;  %343 = vmatprep.mubr.bf16.mxu0 (!%p238_p2), %v1339_v3  ;;  %v1243_v7 = vld [vmem:[%s1641_s2] sm:$0xff] (!%p238_p2)   ;;  %v1244_v9 = vld [vmem:[%s1641_s2 + $0x8] sm:$0xff] (!%p238_p2)   ;;  %v1245_v10 = vld [vmem:[%s1641_s2 + $0x10] sm:$0xff] (!%p238_p2)   ;;  %v1340_v19 = vmov (!%p238_p2), 0.0   ;;  %vm441_vm2 = vcmask (!%p238_p2), 261120  }
   0x7   : > { %v1246_v11 = vld [vmem:[%s1641_s2 + $0x18] sm:$0xff] (!%p238_p2)   ;;  %v1247_v12 = vld [vmem:[%s1641_s2 + $0x20] sm:$0xff] (!%p238_p2)   ;;  %v1248_v13 = vld [vmem:[%s1641_s2 + $0x28] sm:$0xff] (!%p238_p2)   ;;  %1205 = vmatprep.subr.bf16.mxu1 (!%p238_p2), %v1340_v19  ;;  %v1456_v24 = vshrl.u32 (!%p238_p2), %v285_v23, 7  ;;  %vm1341_vm3 = vmmov (!%p238_p2), 0   ;;  %vm538_vm4 = vcmask (!%p238_p2), 785408  }
   0x8   : > { %1125 = vmatprep.subr.msk.bf16.mxu0 (!%p238_p2), %vm304_vm0, %v1124_v1  ;;  %v306_v4 = vsel (!%p238_p2), %vm304_vm0, %v1123_v2, 0  ;;  %v1249_v14 = vld [vmem:[%s1641_s2 + $0x30] sm:$0xff] (!%p238_p2)   ;;  %v1250_v15 = vld [vmem:[%s1641_s2 + $0x38] sm:$0xff] (!%p238_p2)   ;;  %v1251_v16 = vld [vmem:[%s1641_s2 + $0x40] sm:$0xff] (!%p238_p2)   ;;  %1217 = vmatprep.mubr.msk.bf16.mxu1 (!%p238_p2), %vm1341_vm3, %v1340_v19  ;;  %vm590_vm5 = vcmask (!%p238_p2), 1044480   ;;  %vm591_vm6 = vcmask (!%p238_p2), 1045504  }
   0x9   : > { %312 = vmatpush1.bf16.msra.mxu0 (!%p238_p2), %v306_v4  ;;  %v1252_v17 = vld [vmem:[%s1641_s2 + $0x48] sm:$0xff] (!%p238_p2)   ;;  %v1253_v18 = vld [vmem:[%s1642_s3] sm:$0xff] (!%p238_p2)   ;;  %v1255_v21 = vld [vmem:[%s1642_s3 + $0x10] sm:$0xff] (!%p238_p2)   ;;  %v1459_v25 = vsub.s32 (!%p238_p2), 0, %v1456_v24  ;;  %v1465_v27 = vsub.s32 (!%p238_p2), 1, %v1456_v24  ;;  %v1342_v62 = vmov (!%p238_p2), 65535  }
   0xa   : > { %445 = vmatprep.subr.bf16.mxu0 (!%p238_p2), %v1339_v3  ;;  %1206 = vmatpush3.bf16.msra.mxu1 (!%p238_p2), %v1253_v18  ;;  %v1254_v20 = vld [vmem:[%s1642_s3 + $0x8] sm:$0xff] (!%p238_p2)   ;;  %v1256_v22 = vld [vmem:[%s1642_s3 + $0x18] sm:$0xff] (!%p238_p2)   ;;  %v1257_v44 = vld [vmem:[%s1642_s3 + $0x20] sm:$0xff] (!%p238_p2)   ;;  %v592_v63 = vsel (!%p238_p2), %vm590_vm5, 4294967295, %v1342_v62  ;;  %vm586_vm7 = vcmask (!%p238_p2), 89088   ;;  %vm1018_vm8 = vcmask (!%p238_p2), 1040384  }
   0xb   : > { %1207 = vmatprep.subr.bf16.mxu1 (!%p238_p2), %v1340_v19  ;;  %v283_v26 = vld [vmem:[%s1645_s6] ss:$8 sm:$0x3] (!%p238_p2)  ;;  %v380_v46 = vld [vmem:[%s1645_s6 + $0x1] ss:$0 sm:$0xff] (!%p238_p2)  ;;  %v593_v4 = vsel (!%p238_p2), %vm591_vm6, %v592_v63, 0 }
   0xc   : > { %v288_v28 = vrot.slane (!%p238_p2), %v283_v26, %v1459_v25  ;;  %v292_v29 = vrot.slane (!%p238_p2), %v283_v26, %v1465_v27  ;;  %v1258_v45 = vld [vmem:[%s1642_s3 + $0x28] sm:$0xff] (!%p238_p2)   ;;  %v501_v56 = vld [vmem:[%s1645_s6 + $0x2] ss:$0 sm:$0xff] (!%p238_p2)  ;;  %v1274_v18 = vld [vmem:[%s1643_s4 + $0x50] ss:$8 sps:$4 sm:$0xff] (!%p238_p2)   ;;  %vm1020_vm9 = vcmask (!%p238_p2), 573440  }
   0xd   : > { %s1648_s25 = smov (!%p268_p3, %s1115_s25), 1  ;;  %v1285_v26 = vld [vmem:[%s1644_s5 + $0x24] ss:$8 sps:$4 sm:$0xff]   ;;  %vm1059_vm10 = vcmp.lt.s32.totalorder %v285_v23, 199 }
   0xe   : > { %s1195_s28 = sshll.u32 %s1648_s25, 4  ;;  %1208 = vmatpush3.bf16.msra.mxu1 %v1254_v20  ;;  %v1279_v20 = vld [vmem:[%s1644_s5 + $0x4] ss:$8 sps:$4 sm:$0xff]   ;;  %s1122_s13 = sshll.u32 %s1648_s25, 1 }
   0xf   : > { %s272_s8 = scalar_lea.vmem %s1639_s0, %s1195_s28  ;;  %1209 = vmatprep.subr.bf16.mxu1 %v1340_v19  ;;  %s276_s16 = scalar_lea.vmem %s1646_s7, %s1122_s13 }
  0x10   : > { %v279_v5 = vld [vmem:[%s272_s8] sm:$0xff]  ;;  %v280_v6 = vld [vmem:[%s272_s8 + $0x8] sm:$0x7] }
  0x11   : > { %v281_v8 = vpack.c.bf16 %v280_v6, %v279_v5  ;;  %v1261_v6 = vld [vmem:[%s1643_s4 + $0x4] ss:$8 sps:$4 sm:$0xff]  }
  0x12   : > { %1210 = vmatpush3.bf16.msra.mxu1 %v1255_v21  ;;  %v1282_v21 = vld [vmem:[%s1644_s5 + $0x14] ss:$8 sps:$4 sm:$0xff]  }
  0x13   : > { %1126 = vmatmul.mubr.msk.bf16.vlgmr.msra.gmra.mrb[0].mxu0 %vm300_vm1, %v281_v8  ;;  %1211 = vmatprep.subr.bf16.mxu1 %v1340_v19  ;;  %v1259_v8 = vld [vmem:[%s1643_s4] ss:$8 sps:$4 sm:$0xff]  }
  0x14   : > { %446 = vmatpush1.bf16.msra.mxu0 %v1243_v7 }
  0x15   : > { %447 = vmatprep.subr.bf16.mxu0 %v1339_v3 }
  0x16   : > { %1212 = vmatpush3.bf16.msra.mxu1 %v1256_v22  ;;  %v1280_v22 = vld [vmem:[%s1644_s5 + $0x10] ss:$8 sps:$4 sm:$0xff]  }
  0x17   : > { %1213 = vmatprep.subr.bf16.mxu1 %v1340_v19 }
  0x18   : > { %448 = vmatpush1.bf16.msra.mxu0 %v1244_v9  ;;  %v1264_v9 = vld [vmem:[%s1643_s4 + $0x14] ss:$8 sps:$4 sm:$0xff]  }
  0x19   : > { %449 = vmatprep.subr.bf16.mxu0 %v1339_v3 }
  0x1a   : > { %1214 = vmatpush3.bf16.msra.mxu1 %v1257_v44  ;;  %v1307_v44 = vld [vmem:[%s1644_s5 + $0xa0] ss:$8 sps:$4 sm:$0xff]  }
  0x1b   : > { %1215 = vmatprep.subr.bf16.mxu1 %v1340_v19 }
  0x1c   : > { %450 = vmatpush1.bf16.msra.mxu0 %v1245_v10  ;;  %v1343_v10 = vmov 1065369472  }
  0x1d   : > { %451 = vmatprep.subr.bf16.mxu0 %v1339_v3 }
  0x1e   : > { %1216 = vmatpush3.bf16.msra.mxu1 %v1258_v45  ;;  %v1312_v45 = vld [vmem:[%s1644_s5 + $0xb4] ss:$8 sps:$4 sm:$0xff]  }
  0x1f   : > { %977 = vmatprep.subr.bf16.mxu1 %v1279_v20 }
  0x20   : > { %452 = vmatpush1.bf16.msra.mxu0 %v1246_v11  ;;  %v1262_v11 = vld [vmem:[%s1643_s4 + $0x10] ss:$8 sps:$4 sm:$0xff]  }
  0x21   : > { %453 = vmatprep.subr.bf16.mxu0 %v1339_v3 }
  0x24   : > { %454 = vmatpush1.bf16.msra.mxu0 %v1247_v12  ;;  %v1267_v12 = vld [vmem:[%s1643_s4 + $0x24] ss:$8 sps:$4 sm:$0xff]  }
  0x25   : > { %455 = vmatprep.subr.bf16.mxu0 %v1339_v3 }
  0x28   : > { %456 = vmatpush1.bf16.msra.mxu0 %v1248_v13  ;;  %v1265_v13 = vld [vmem:[%s1643_s4 + $0x20] ss:$8 sps:$4 sm:$0xff]  }
  0x29   : > { %457 = vmatprep.subr.bf16.mxu0 %v1339_v3 }
  0x2c   : > { %458 = vmatpush1.bf16.msra.mxu0 %v1249_v14  ;;  %v1270_v14 = vld [vmem:[%s1643_s4 + $0x34] ss:$8 sps:$4 sm:$0xff]  }
  0x2d   : > { %459 = vmatprep.subr.bf16.mxu0 %v1339_v3 }
  0x30   : > { %460 = vmatpush1.bf16.msra.mxu0 %v1250_v15  ;;  %v1273_v15 = vld [vmem:[%s1643_s4 + $0x44] ss:$8 sps:$4 sm:$0xff]  }
  0x31   : > { %461 = vmatprep.subr.bf16.mxu0 %v1339_v3 }
  0x34   : > { %462 = vmatpush1.bf16.msra.mxu0 %v1251_v16  ;;  %v1271_v16 = vld [vmem:[%s1643_s4 + $0x40] ss:$8 sps:$4 sm:$0xff]  }
  0x35   : > { %463 = vmatprep.subr.bf16.mxu0 %v1339_v3 }
  0x38   : > { %464 = vmatpush1.bf16.msra.mxu0 %v1252_v17  ;;  %v1276_v17 = vld [vmem:[%s1643_s4 + $0x54] ss:$8 sps:$4 sm:$0xff]  }
  0x39   : > { %1221 = vmatprep.subr.bf16.mxu0 %v1340_v19 }
  0xe6   : > { %v345_v30 = vpop.f32.mrb[0].mxu0 }
  0xe7   : > { %v346_v31 = vadd.f32 %v345_v30, %v288_v28  ;;  %v347_v32 = vpop.f32.mrb[1].mxu0  ;;  %v1286_v30 = vld [vmem:[%s1644_s5 + $0x30] ss:$8 sps:$4 sm:$0xff]  }
  0xe8   : > { %v348_v33 = vadd.f32 %v347_v32, %v292_v29  ;;  %v349_v34 = vpop.f32.mrb[2].mxu0  ;;  %v1289_v32 = vld [vmem:[%s1644_s5 + $0x40] ss:$8 sps:$4 sm:$0xff]  }
  0xe9   : > { %v350_v35 = vadd.f32 %v349_v34, %v288_v28  ;;  %v351_v36 = vpop.f32.mrb[3].mxu0  ;;  %v354_v38 = vmax.f32 %v346_v31, 0.0  ;;  %v1283_v28 = vld [vmem:[%s1644_s5 + $0x20] ss:$8 sps:$4 sm:$0xff]   ;;  %v1291_v31 = vld [vmem:[%s1644_s5 + $0x44] ss:$8 sps:$4 sm:$0xff]  }
  0xea   : > { %v352_v37 = vadd.f32 %v351_v36, %v292_v29  ;;  %v355_v40 = vmax.f32 %v348_v33, 0.0  ;;  %v1288_v29 = vld [vmem:[%s1644_s5 + $0x34] ss:$8 sps:$4 sm:$0xff]   ;;  %v1292_v34 = vld [vmem:[%s1644_s5 + $0x50] ss:$8 sps:$4 sm:$0xff]  }
  0xeb   : > { %v356_v39 = vmax.f32 %v350_v35, 0.0  ;;  %v1294_v33 = vld [vmem:[%s1644_s5 + $0x54] ss:$8 sps:$4 sm:$0xff]   ;;  %v1297_v35 = vld [vmem:[%s1644_s5 + $0x64] ss:$8 sps:$4 sm:$0xff]  }
  0xec   : > { %v357_v41 = vmax.f32 %v352_v37, 0.0  ;;  %v1295_v36 = vld [vmem:[%s1644_s5 + $0x60] ss:$8 sps:$4 sm:$0xff]   ;;  %v1300_v37 = vld [vmem:[%s1644_s5 + $0x74] ss:$8 sps:$4 sm:$0xff]  }
  0xed   : > { %v358_v42 = vpack.c.bf16 %v356_v39, %v354_v38  ;;  %v1298_v38 = vld [vmem:[%s1644_s5 + $0x70] ss:$8 sps:$4 sm:$0xff]   ;;  %v1303_v39 = vld [vmem:[%s1644_s5 + $0x84] ss:$8 sps:$4 sm:$0xff]  }
  0xee   : > { %v359_v43 = vpack.c.bf16 %v357_v41, %v355_v40  ;;  %v1301_v40 = vld [vmem:[%s1644_s5 + $0x80] ss:$8 sps:$4 sm:$0xff]   ;;  %v1306_v41 = vld [vmem:[%s1644_s5 + $0x94] ss:$8 sps:$4 sm:$0xff]  }
  0xf0   : > { %1137 = vmatprep.mubr.msk.bf16.mxu0 %vm441_vm2, %v359_v43  ;;  %v1309_v43 = vld [vmem:[%s1644_s5 + $0xa4] ss:$8 sps:$4 sm:$0xff]  }
  0xf1   : > { %478 = vmatmul.mubr.bf16.vlgmr.msra.gmra.mrb[4].mxu0 %v358_v42  ;;  %v1304_v42 = vld [vmem:[%s1644_s5 + $0x90] ss:$8 sps:$4 sm:$0xff]  }
  0xf2   : > { %1223 = vmatprep.mubr.msk.bf16.mxu0 %vm1341_vm3, %v1340_v19  ;;  %v1277_v19 = vld [vmem:[%s1644_s5] ss:$8 sps:$4 sm:$0xff]  }
 0x1c4   : > { %v479_v47 = vpop.f32.mrb[4].mxu0 }
 0x1c5   : > { %v480_v48 = vadd.f32 %v479_v47, %v380_v46  ;;  %v481_v49 = vpop.f32.mrb[5].mxu0  ;;  %v1315_v47 = vld [vmem:[%s1644_s5 + $0xc4] ss:$8 sps:$4 sm:$0xff]  }
 0x1c6   : > { %v482_v50 = vpop.f32.mrb[6].mxu0  ;;  %v1318_v49 = vld [vmem:[%s1644_s5 + $0xd4] ss:$8 sps:$4 sm:$0xff]  }
 0x1c7   : > { %v483_v51 = vadd.f32 %v482_v50, %v380_v46  ;;  %v484_v52 = vpop.f32.mrb[7].mxu0  ;;  %v486_v53 = vmax.f32 %v480_v48, 0.0  ;;  %v1310_v46 = vld [vmem:[%s1644_s5 + $0xb0] ss:$8 sps:$4 sm:$0xff]   ;;  %v1313_v48 = vld [vmem:[%s1644_s5 + $0xc0] ss:$8 sps:$4 sm:$0xff]  }
 0x1c8   : > { %v1316_v50 = vld [vmem:[%s1644_s5 + $0xd0] ss:$8 sps:$4 sm:$0xff]  }
 0x1c9   : > { %v487_v54 = vmax.f32 %v483_v51, 0.0 }
 0x1cb   : > { %v488_v55 = vpack.c.bf16 %v487_v54, %v486_v53 }
 0x1cd   : > { %1218 = vmatmul.mubr.msk.bf16.vlgmr.msra.gmra.mrb[0].mxu1 %vm538_vm4, %v488_v55 }
 0x1ce   : > { %978 = vmatpush1.bf16.msra.mxu1 %v1277_v19 }
 0x1cf   : > { %979 = vmatprep.subr.bf16.mxu1 %v1282_v21 }
 0x1d2   : > { %980 = vmatpush1.bf16.msra.mxu1 %v1280_v22 }
 0x1d3   : > { %981 = vmatprep.subr.bf16.mxu1 %v1285_v26 }
 0x1d6   : > { %982 = vmatpush1.bf16.msra.mxu1 %v1283_v28 }
 0x1d7   : > { %983 = vmatprep.subr.bf16.mxu1 %v1288_v29 }
 0x1da   : > { %984 = vmatpush1.bf16.msra.mxu1 %v1286_v30 }
 0x1db   : > { %985 = vmatprep.subr.bf16.mxu1 %v1291_v31 }
 0x1de   : > { %986 = vmatpush1.bf16.msra.mxu1 %v1289_v32 }
 0x1df   : > { %987 = vmatprep.subr.bf16.mxu1 %v1294_v33 }
 0x1e2   : > { %988 = vmatpush1.bf16.msra.mxu1 %v1292_v34 }
 0x1e3   : > { %989 = vmatprep.subr.bf16.mxu1 %v1297_v35  ;;  %v1344_v35 = vmov 1966171168  }
 0x1e6   : > { %990 = vmatpush1.bf16.msra.mxu1 %v1295_v36  ;;  %v1043_v36 = vunpack.c.l.s4 %v1344_v35 }
 0x1e7   : > { %991 = vmatprep.subr.bf16.mxu1 %v1300_v37 }
 0x1e8   : > { %v1044_v37 = vunpack.c.0.s8 %v1043_v36 }
 0x1ea   : > { %992 = vmatpush1.bf16.msra.mxu1 %v1298_v38 }
 0x1eb   : > { %993 = vmatprep.subr.bf16.mxu1 %v1303_v39  ;;  %v1047_v39 = vsub.s32 %v1044_v37, %v1456_v24 }
 0x1ee   : > { %994 = vmatpush1.bf16.msra.mxu1 %v1301_v40 }
 0x1ef   : > { %995 = vmatprep.subr.bf16.mxu1 %v1306_v41 }
 0x1f2   : > { %996 = vmatpush1.bf16.msra.mxu1 %v1304_v42 }
 0x1f3   : > { %997 = vmatprep.subr.bf16.mxu1 %v1309_v43 }
 0x1f6   : > { %998 = vmatpush1.bf16.msra.mxu1 %v1307_v44 }
 0x1f7   : > { %999 = vmatprep.subr.bf16.mxu1 %v1312_v45 }
 0x1fa   : > { %1000 = vmatpush1.bf16.msra.mxu1 %v1310_v46 }
 0x1fb   : > { %1001 = vmatprep.subr.bf16.mxu1 %v1315_v47 }
 0x1fe   : > { %1002 = vmatpush1.bf16.msra.mxu1 %v1313_v48 }
 0x1ff   : > { %1003 = vmatprep.subr.bf16.mxu1 %v1318_v49 }
 0x202   : > { %1004 = vmatpush1.bf16.msra.mxu1 %v1316_v50 }
 0x2a0   : > { %v576_v57 = vpop.f32.mrb[0].mxu1 }
 0x2a1   : > { %v577_v58 = vadd.f32 %v576_v57, %v501_v56  ;;  %v1219_v59 = vpop.f32.mrb[1].mxu1  ;;  %v1321_v57 = vld [vmem:[%s1644_s5 + $0xe4] ss:$8 sps:$4 sm:$0xff]  }
 0x2a2   : > { %v579_v60 = vpop.f32.mrb[2].mxu1  ;;  %1005 = vmatprep.subr.bf16.mxu1 %v1321_v57  ;;  %v1324_v59 = vld [vmem:[%s1644_s5 + $0xf4] ss:$8 sps:$4 sm:$0xff]  }
 0x2a3   : > { %v580_v61 = vadd.f32 %v579_v60, %v501_v56  ;;  %v1220_v0 = vpop.f32.mrb[3].mxu1  ;;  %v583_v1 = vmax.f32 %v577_v58, 0.0  ;;  %v1319_v58 = vld [vmem:[%s1644_s5 + $0xe0] ss:$8 sps:$4 sm:$0xff]   ;;  %v1322_v60 = vld [vmem:[%s1644_s5 + $0xf0] ss:$8 sps:$4 sm:$0xff]  }
 0x2a4   : > { %1006 = vmatpush1.bf16.msra.mxu1 %v1319_v58 }
 0x2a5   : > { %v584_v2 = vmax.f32 %v580_v61, 0.0  ;;  %1007 = vmatprep.subr.bf16.mxu1 %v1324_v59  ;;  %v1146_v61 = vld [vmem:[%s1645_s6 + $0x3] ss:$8 sm:$0x3] }
 0x2a6   : > { %v717_v62 = vrot.slane %v1146_v61, %v1459_v25  ;;  %v721_v63 = vrot.slane %v1146_v61, %v1465_v27 }
 0x2a7   : > { %v585_v5 = vpack.c.bf16 %v584_v2, %v583_v1 }
 0x2a8   : > { %1008 = vmatpush1.bf16.msra.mxu1 %v1322_v60 }
 0x2a9   : > { %v595_v7 = vand.u32 %v593_v4, %v585_v5 }
 0x2ab   : > { %1222 = vmatpush3.bf16.msra.mxu0 %v595_v7 }
 0x2ac   : > { %727 = vmatprep.subr.bf16.mxu0 %v1261_v6 }
 0x2ae   : > { %1224 = vmatmul.mubr.msk.bf16.vlgmr.msra.gmra.mrb[8].mxu0 %vm586_vm7, %v1343_v10 }
 0x2af   : > { %728 = vmatpush1.bf16.msra.mxu0 %v1259_v8  ;;  %759 = vmatprep.mubr.bf16.mxu0 %v1339_v3  ;;  %v1268_v3 = vld [vmem:[%s1643_s4 + $0x30] ss:$8 sps:$4 sm:$0xff]  }
 0x2b0   : > { %729 = vmatprep.subr.bf16.mxu0 %v1264_v9 }
 0x2b3   : > { %730 = vmatpush1.bf16.msra.mxu0 %v1262_v11  ;;  %v1160_v11 = vld [vmem:[%s1645_s6 + $0x4] ss:$8 sm:$0x3] }
 0x2b4   : > { %731 = vmatprep.subr.bf16.mxu0 %v1267_v12  ;;  %v970_v12 = vrot.slane %v1160_v11, %v1459_v25 }
 0x2b7   : > { %732 = vmatpush1.bf16.msra.mxu0 %v1265_v13  ;;  %v974_v13 = vrot.slane %v1160_v11, %v1465_v27 }
 0x2b8   : > { %733 = vmatprep.subr.bf16.mxu0 %v1270_v14 }
 0x2bb   : > { %734 = vmatpush1.bf16.msra.mxu0 %v1268_v3 }
 0x2bc   : > { %735 = vmatprep.subr.bf16.mxu0 %v1273_v15 }
 0x2bf   : > { %736 = vmatpush1.bf16.msra.mxu0 %v1271_v16 }
 0x2c0   : > { %737 = vmatprep.subr.bf16.mxu0 %v1276_v17 }
 0x2c3   : > { %738 = vmatpush1.bf16.msra.mxu0 %v1274_v18 }
 0x381   : > { %v631_v51 = vpop.f32.mrb[8].mxu0 }
 0x382   : > { %v637_v52 = vmul.f32 0.09090909, %v631_v51  ;;  %v1225_v53 = vpop.f32.mrb[9].mxu0 }
 0x383   : > { %v634_v54 = vpop.f32.mrb[10].mxu0 }
 0x384   : > { %v638_v55 = vpack.c.bf16 %v637_v52, %v637_v52  ;;  %v1226_v56 = vpop.f32.mrb[11].mxu0 }
 0x386   : > { %1159 = vmatmul.mubr.msk.bf16.vlgmr.msra.gmra.mrb[12].mxu0 %vm538_vm4, %v638_v55 }
 0x459   : > { %v761_v0 = vpop.f32.mrb[12].mxu0 }
 0x45a   : > { %v762_v1 = vadd.f32 %v761_v0, %v717_v62  ;;  %v763_v2 = vpop.f32.mrb[13].mxu0 }
 0x45b   : > { %v764_v4 = vadd.f32 %v763_v2, %v721_v63  ;;  %v765_v5 = vpop.f32.mrb[14].mxu0 }
 0x45c   : > { %v768_v6 = vmax.f32 %v762_v1, 0.0  ;;  %v766_v7 = vpop.f32.mrb[15].mxu0 }
 0x45d   : > { %v769_v8 = vmax.f32 %v764_v4, 0.0 }
 0x45e   : > { %v770_v10 = vpack.c.bf16 %v768_v6, %v768_v6 }
 0x45f   : > { %v771_v9 = vpack.c.bf16 %v769_v8, %v769_v8 }
 0x461   : > { %1009 = vmatprep.mubr.bf16.mxu1 %v771_v9 }
 0x462   : > { %1010 = vmatmul.mubr.bf16.vlgmr.msra.gmra.mrb[4].mxu1 %v770_v10 }
 0x535   : > { %v1011_v14 = vpop.f32.mrb[4].mxu1 }
 0x536   : > { %v1012_v3 = vadd.f32 %v1011_v14, %v970_v12  ;;  %v1013_v15 = vpop.f32.mrb[5].mxu1 }
 0x537   : > { %v1014_v16 = vadd.f32 %v1013_v15, %v974_v13  ;;  %v1015_v17 = vpop.f32.mrb[6].mxu1 }
 0x538   : > { %v1016_v18 = vpop.f32.mrb[7].mxu1  ;;  %v1019_v19 = vsel %vm1018_vm8, %v1012_v3, -inf }
 0x539   : > { %v1021_v20 = vsel %vm1020_vm9, %v1014_v16, -inf }
 0x53a   : > { %v1022_v21 = vmax.f32 %v1019_v19, %v1021_v20 }
 0x53c   : > { %1023 = vmax.xlane.f32.xlu0 %v1022_v21 }
 0x5c9   : > { %v1024_v22 = vpop.xlane.xlu0 %1023 }
 0x5ca   : > { %v1025_v26 = vsub.f32 %v1012_v3, %v1024_v22  ;;  %v1026_v28 = vsub.f32 %v1014_v16, %v1024_v22 }
 0x5cc   : > { %v1027_v25 = vmul.f32 1.442695, %v1025_v26  ;;  %v1029_v29 = vmul.f32 1.442695, %v1026_v28 }
 0x5ce   : > { %1325 = vpow2.f32 %v1027_v25 }
 0x5cf   : > { %1327 = vpow2.f32 %v1029_v29 }
 0x5d8   : > { %v1326_v27 = vpop.eup %1325 }
 0x5d9   : > { %v1328_v30 = vpop.eup %1327  ;;  %v1031_v31 = vsel %vm1018_vm8, %v1326_v27, 0.0 }
 0x5da   : > { %v1032_v32 = vsel %vm1020_vm9, %v1328_v30, 0.0 }
 0x5db   : > { %v1033_v33 = vadd.f32 %v1032_v32, %v1031_v31 }
 0x5dd   : > { %1034 = vadd.xlane.f32.xlu0 %v1033_v33 }
 0x66a   : > { %v1035_v34 = vpop.xlane.xlu0 %1034 }
 0x66b   : > { %1329 = vrcp.f32 %v1035_v34 }
 0x675   : > { %v1330_v38 = vpop.eup %1329 }
 0x676   : > { %v1037_v40 = vmul.f32 %v1330_v38, %v1326_v27  ;;  %v1038_v41 = vmul.f32 %v1330_v38, %v1328_v30 }
 0x678   : > { %v1041_v42 = vcombine.low %v1037_v40, %v1038_v41 }
 0x67a   : > { %v1048_v43 = vrot.slane %v1041_v42, %v1047_v39 }
 0x67c   : > { %v1055_v44 = vrot.slane %v1048_v43, %v1047_v39 }
 0x67e   : > { %1061 = vst.msk [vmem:[%s276_s16] sm:$0x3] %vm1059_vm10, %v1055_v44 }
 0x67f PF: > { %s17_s24 = sadd.s32 1, %s1337_s24  }
 0x680   : > { %p14_p4 = scmp.ge.s32.totalorder %s17_s24, 4  }
 0x682   :  { %16 = sbr.rel (!%p14_p4) target bundleno = 1 (0x1), region = 80 }

</bundles_post_ra>
